<compile_context>
chip_gen: v6e
topology: v6e:2x2x1
jax: 0.10.0
libtpu: 0.0.40
codegen_flags: <defaults>
</compile_context>

<pallas_src>
import functools

import jax
import jax.numpy as jnp
from jax import lax
from jax.experimental import pallas as pl
from jax.experimental.pallas import tpu as pltpu

_LANE = 128
_MASK_VALUE = -1e30  # finite "minus infinity": exp() underflows to exactly 0, no NaNs


def _round_up(x: int, m: int) -> int:
    return (x + m - 1) // m * m


def _flash_attn_kernel(
    # scalar-prefetch refs (SMEM)
    q_ids_ref, k_ids_ref,
    # inputs (VMEM tiles)
    xq_ref, xkv_ref, wq_ref, wkv_ref,
    # output (VMEM tile)
    o_ref,
    # VMEM scratch (persist across the KV loop of each Q tile)
    q_sc, m_sc, l_sc, acc_sc,
    *, tile: int, hp: int, scale: float, causal: bool, nk: int, seq_len: int):
    s = pl.program_id(1)
    qi = q_ids_ref[s]
    ki = k_ids_ref[s]

    # ---- new Q tile: project Q once, reset online-softmax state -----------------
    @pl.when(ki == 0)
    def _():
        q_sc[...] = jnp.dot(xq_ref[0], wq_ref[...],
                            preferred_element_type=jnp.float32).astype(q_sc.dtype)
        m_sc[...] = jnp.full_like(m_sc, _MASK_VALUE)
        l_sc[...] = jnp.zeros_like(l_sc)
        acc_sc[...] = jnp.zeros_like(acc_sc)

    # ---- fused K|V projection of the current KV tile (single MXU matmul) --------
    kv = jnp.dot(xkv_ref[0], wkv_ref[...],
                 preferred_element_type=jnp.float32).astype(q_sc.dtype)
    k = kv[:, :hp]       # (tile, hp)  lane-aligned slice
    v = kv[:, hp:]       # (tile, hp)

    # ---- scores: contract the head axis directly (no explicit transpose) --------
    scores = lax.dot_general(q_sc[...], k, (((1,), (1,)), ((), ())),
                             preferred_element_type=jnp.float32) * scale  # (tile, tile)

    # ---- masking -----------------------------------------------------------------
    if causal:
        # Single compare; off-diagonal (ki < qi) tiles are trivially all-kept, and
        # padded key columns (>= seq_len) are excluded for every real query row.
        row = lax.broadcasted_iota(jnp.int32, (tile, tile), 0)
        col = lax.broadcasted_iota(jnp.int32, (tile, tile), 1)
        scores = jnp.where((col - row) <= (qi - ki) * tile, scores, _MASK_VALUE)
    elif seq_len % tile != 0:
        # Only needed to mask zero-padded key rows.
        col = lax.broadcasted_iota(jnp.int32, (tile, tile), 1)
        scores = jnp.where(ki * tile + col < seq_len, scores, _MASK_VALUE)

    # ---- online softmax update ---------------------------------------------------
    m_prev = m_sc[...]                                               # (tile, 1)
    m_new = jnp.maximum(m_prev, jnp.max(scores, axis=-1, keepdims=True))
    alpha = jnp.exp(m_prev - m_new)
    p = jnp.exp(scores - m_new)                                      # (tile, tile) f32
    l_sc[...] = alpha * l_sc[...] + jnp.sum(p, axis=-1, keepdims=True)
    acc_sc[...] = alpha * acc_sc[...] + jnp.dot(
        p.astype(v.dtype), v, preferred_element_type=jnp.float32)
    m_sc[...] = m_new

    # ---- finalize on the last contributing KV tile of this Q tile -----------------
    last_ki = qi if causal else nk - 1
    @pl.when(ki == last_ki)
    def _():
        # Reciprocal runs once per Q tile (folded into the finalize scale).
        o_ref[0] = (acc_sc[...] * pl.reciprocal(l_sc[...], approx=False)
                    ).astype(o_ref.dtype)


def self_attention_block(x, wk, wq, wv, *, mask_future: bool = True,
                         block_size: int = 128):
    """x: (B, T, C); wk/wq/wv: (C, H) (already transposed vs nn.Linear) -> (B, T, H)."""
    B, T, C = x.shape
    H = wq.shape[1]
    dtype = x.dtype

    hp = _round_up(max(H, _LANE), _LANE)          # lane-dense head dim
    tile = min(block_size, _round_up(T, 8))       # tq == tk
    tp = _round_up(T, tile)                       # padded sequence length

    if tp != T:
        x = jnp.pad(x, ((0, 0), (0, tp - T), (0, 0)))

    # Pad head dim of the weights; fuse K|V into one (C, 2*hp) projection matrix.
    def _pad_w(w):
        return jnp.pad(w.astype(dtype), ((0, 0), (0, hp - H)))
    wq_p = _pad_w(wq)
    wkv_p = jnp.concatenate([_pad_w(wk), _pad_w(wv)], axis=1)

    nq = nk = tp // tile
    if mask_future:
        pairs = [(qi, ki) for qi in range(nq) for ki in range(qi + 1)]
    else:
        pairs = [(qi, ki) for qi in range(nq) for ki in range(nk)]
    q_ids = jnp.asarray([p[0] for p in pairs], dtype=jnp.int32)
    k_ids = jnp.asarray([p[1] for p in pairs], dtype=jnp.int32)

    scale = float(C) ** -0.5   # module scales by input features C, not head_size

    kernel = functools.partial(
        _flash_attn_kernel, tile=tile, hp=hp, scale=scale,
        causal=mask_future, nk=nk, seq_len=T)

    out = pl.pallas_call(
        kernel,
        out_shape=jax.ShapeDtypeStruct((B, tp, hp), dtype),
        grid_spec=pltpu.PrefetchScalarGridSpec(
            num_scalar_prefetch=2,
            grid=(B, len(pairs)),
            in_specs=[
                pl.BlockSpec((1, tile, C), lambda b, s, qid, kid: (b, qid[s], 0)),
                pl.BlockSpec((1, tile, C), lambda b, s, qid, kid: (b, kid[s], 0)),
                pl.BlockSpec((C, hp), lambda b, s, qid, kid: (0, 0)),
                pl.BlockSpec((C, 2 * hp), lambda b, s, qid, kid: (0, 0)),
            ],
            out_specs=pl.BlockSpec((1, tile, hp),
                                   lambda b, s, qid, kid: (b, qid[s], 0)),
            scratch_shapes=[
                pltpu.VMEM((tile, hp), dtype),        # q tile (input dtype for MXU)
                pltpu.VMEM((tile, 1), jnp.float32),   # running max m
                pltpu.VMEM((tile, 1), jnp.float32),   # running denom l
                pltpu.VMEM((tile, hp), jnp.float32),  # f32 accumulator
            ],
        ),
        compiler_params=pltpu.CompilerParams(
            dimension_semantics=("parallel", "arbitrary")),
    )(q_ids, k_ids, x, x, wq_p, wkv_p)

    return out[:, :T, :H]


def _reference(x, wk, wq, wv, mask_future=True):
    k = x @ wk
    q = x @ wq
    v = x @ wv
    C = x.shape[-1]
    w = (q @ jnp.swapaxes(k, -2, -1)) * (C ** -0.5)
    if mask_future:
        T = x.shape[1]
        tril = jnp.tril(jnp.ones((T, T)))
        w = jnp.where(tril == 0, -jnp.inf, w)
    w = jax.nn.softmax(w, axis=-1)
    return w @ v


if __name__ == "__main__":
    # Module hyperparams (deterministic synthetic init).
    batch, seq, input_features, head_size = 2, 8, 32, 16
    mask_future = True
    dropout = 0.0  # eval mode -> identity

    key = jax.random.PRNGKey(0)
    kx, kk, kq, kv, kx2 = jax.random.split(key, 5)

    x = jax.random.normal(kx, (batch, seq, input_features), dtype=jnp.float32)
    # nn.Linear(input_features, head_size, bias=False).weight is (head_size, input_features);
    # store transposed so the kernel computes x @ W.
    wk = (jax.random.normal(kk, (head_size, input_features), dtype=jnp.float32)
          * (input_features ** -0.5)).T
    wq = (jax.random.normal(kq, (head_size, input_features), dtype=jnp.float32)
          * (input_features ** -0.5)).T
    wv = (jax.random.normal(kv, (head_size, input_features), dtype=jnp.float32)
          * (input_features ** -0.5)).T

    out = self_attention_block(x, wk, wq, wv, mask_future=mask_future)
    out = jax.block_until_ready(out)
    ref = _reference(x, wk, wq, wv, mask_future=mask_future)
    assert out.shape == (batch, seq, head_size)
    assert jnp.allclose(out, ref, atol=2e-5, rtol=2e-5), "mismatch vs JAX reference (T=8)"

    # Exercise the tiled flash path: multi-tile T with sequence padding, off-diagonal
    # + diagonal tiles, structural causal skipping, and the non-causal branch.
    seq2 = 160
    x2 = jax.random.normal(kx2, (batch, seq2, input_features), dtype=jnp.float32)
    for mf in (True, False):
        out2 = jax.block_until_ready(
            self_attention_block(x2, wk, wq, wv, mask_future=mf, block_size=128))
        ref2 = _reference(x2, wk, wq, wv, mask_future=mf)
        assert out2.shape == (batch, seq2, head_size)
        assert jnp.allclose(out2, ref2, atol=1e-4, rtol=1e-4), \
            f"mismatch vs JAX reference (T=160, mask_future={mf})"

    print("KERNEL_OK")
</pallas_src>

<mosaic_0001>
module attributes {stable_mosaic.version = 11 : i64} {
  func.func @_flash_attn_kernel(%arg0: i32, %arg1: i32, %arg2: memref<1xi32, #tpu.memory_space<smem>>, %arg3: memref<1xi32, #tpu.memory_space<smem>>, %arg4: memref<1x8x32xf32, #tpu.memory_space<vmem>>, %arg5: memref<1x8x32xf32, #tpu.memory_space<vmem>>, %arg6: memref<32x128xf32, #tpu.memory_space<vmem>>, %arg7: memref<32x256xf32, #tpu.memory_space<vmem>>, %arg8: memref<1x8x128xf32, #tpu.memory_space<vmem>>, %arg9: memref<8x128xf32, #tpu.memory_space<vmem>>, %arg10: memref<8x1xf32, #tpu.memory_space<vmem>>, %arg11: memref<8x1xf32, #tpu.memory_space<vmem>>, %arg12: memref<8x128xf32, #tpu.memory_space<vmem>>) attributes {dimension_semantics = [#tpu.dimension_semantics<parallel>, #tpu.dimension_semantics<arbitrary>], iteration_bounds = array<i64: 2, 1>, scalar_prefetch = 2 : i64, scratch_operands = 4 : i64, tpu.core_type = #tpu.core_type<tc>, window_params = [{transform_indices = @transform_0, window_bounds = array<i64: 1, 8, 32>}, {transform_indices = @transform_1, window_bounds = array<i64: 1, 8, 32>}, {pipeline_mode = #tpu.pipeline_mode<synchronous>, transform_indices = @transform_2, window_bounds = array<i64: 32, 128>}, {pipeline_mode = #tpu.pipeline_mode<synchronous>, transform_indices = @transform_3, window_bounds = array<i64: 32, 256>}, {transform_indices = @transform_4, window_bounds = array<i64: 1, 8, 128>}]} {
    %0 = arith.index_cast %arg1 : i32 to index
    %1 = memref.load %arg2[%0] : memref<1xi32, #tpu.memory_space<smem>>
    %2 = arith.index_cast %arg1 : i32 to index
    %3 = memref.load %arg3[%2] : memref<1xi32, #tpu.memory_space<smem>>
    %c0_i32 = arith.constant 0 : i32
    %4 = arith.cmpi eq, %3, %c0_i32 : i32
    %5 = arith.extui %4 : i1 to i32
    %c0_i32_0 = arith.constant 0 : i32
    %6 = arith.cmpi ne, %5, %c0_i32_0 : i32
    scf.if %6 {
      %c0_26 = arith.constant 0 : index
      %c0_27 = arith.constant 0 : index
      %c0_28 = arith.constant 0 : index
      %51 = vector.load %arg4[%c0_26, %c0_27, %c0_28] : memref<1x8x32xf32, #tpu.memory_space<vmem>>, vector<1x8x32xf32>
      %52 = vector.shape_cast %51 : vector<1x8x32xf32> to vector<8x32xf32>
      %c0_29 = arith.constant 0 : index
      %c0_30 = arith.constant 0 : index
      %53 = vector.load %arg6[%c0_29, %c0_30] : memref<32x128xf32, #tpu.memory_space<vmem>>, vector<32x128xf32>
      %cst_31 = arith.constant dense<0.000000e+00> : vector<8x128xf32>
      %54 = tpu.matmul %52, %53, %cst_31 {dimension_numbers = #tpu.dot_dimension_numbers<[1], [0], [0], [1], [0, 0, 1, 1], [], []>} : vector<8x32xf32>, vector<32x128xf32>, vector<8x128xf32> -> vector<8x128xf32>
      %c0_32 = arith.constant 0 : index
      %c0_33 = arith.constant 0 : index
      %55 = vector.load %arg9[%c0_32, %c0_33] : memref<8x128xf32, #tpu.memory_space<vmem>>, vector<8x128xf32>
      tpu.vector_store %arg9[%c0_32, %c0_33], %54 {strides = array<i32>} : memref<8x128xf32, #tpu.memory_space<vmem>>, vector<8x128xf32>,
      %cst_34 = arith.constant -1.000000e+30 : f32
      %56 = vector.broadcast %cst_34 : f32 to vector<8x1xf32>
      %c0_35 = arith.constant 0 : index
      %c0_36 = arith.constant 0 : index
      %57 = vector.load %arg10[%c0_35, %c0_36] : memref<8x1xf32, #tpu.memory_space<vmem>>, vector<8x1xf32>
      tpu.vector_store %arg10[%c0_35, %c0_36], %56 {strides = array<i32>} : memref<8x1xf32, #tpu.memory_space<vmem>>, vector<8x1xf32>,
      %cst_37 = arith.constant 0.000000e+00 : f32
      %58 = vector.broadcast %cst_37 : f32 to vector<8x1xf32>
      %c0_38 = arith.constant 0 : index
      %c0_39 = arith.constant 0 : index
      %59 = vector.load %arg11[%c0_38, %c0_39] : memref<8x1xf32, #tpu.memory_space<vmem>>, vector<8x1xf32>
      tpu.vector_store %arg11[%c0_38, %c0_39], %58 {strides = array<i32>} : memref<8x1xf32, #tpu.memory_space<vmem>>, vector<8x1xf32>,
      %cst_40 = arith.constant 0.000000e+00 : f32
      %60 = vector.broadcast %cst_40 : f32 to vector<8x128xf32>
      %c0_41 = arith.constant 0 : index
      %c0_42 = arith.constant 0 : index
      %61 = vector.load %arg12[%c0_41, %c0_42] : memref<8x128xf32, #tpu.memory_space<vmem>>, vector<8x128xf32>
      tpu.vector_store %arg12[%c0_41, %c0_42], %60 {strides = array<i32>} : memref<8x128xf32, #tpu.memory_space<vmem>>, vector<8x128xf32>,
    } else {
    }
    %c0 = arith.constant 0 : index
    %c0_1 = arith.constant 0 : index
    %c0_2 = arith.constant 0 : index
    %7 = vector.load %arg5[%c0, %c0_1, %c0_2] : memref<1x8x32xf32, #tpu.memory_space<vmem>>, vector<1x8x32xf32>
    %8 = vector.shape_cast %7 : vector<1x8x32xf32> to vector<8x32xf32>
    %c0_3 = arith.constant 0 : index
    %c0_4 = arith.constant 0 : index
    %9 = vector.load %arg7[%c0_3, %c0_4] : memref<32x256xf32, #tpu.memory_space<vmem>>, vector<32x256xf32>
    %cst = arith.constant dense<0.000000e+00> : vector<8x256xf32>
    %10 = tpu.matmul %8, %9, %cst {dimension_numbers = #tpu.dot_dimension_numbers<[1], [0], [0], [1], [0, 0, 1, 1], [], []>} : vector<8x32xf32>, vector<32x256xf32>, vector<8x256xf32> -> vector<8x256xf32>
    %11 = vector.extract_strided_slice %10 {offsets = [0, 0], sizes = [8, 128], strides = [1, 1]} : vector<8x256xf32> to vector<8x128xf32>
    %12 = vector.extract_strided_slice %10 {offsets = [0, 128], sizes = [8, 128], strides = [1, 1]} : vector<8x256xf32> to vector<8x128xf32>
    %c0_5 = arith.constant 0 : index
    %c0_6 = arith.constant 0 : index
    %13 = vector.load %arg9[%c0_5, %c0_6] : memref<8x128xf32, #tpu.memory_space<vmem>>, vector<8x128xf32>
    %cst_7 = arith.constant dense<0.000000e+00> : vector<8x8xf32>
    %14 = tpu.matmul %13, %11, %cst_7 {dimension_numbers = #tpu.dot_dimension_numbers<[1], [1], [0], [0], [0, 0, 1, 0], [], []>} : vector<8x128xf32>, vector<8x128xf32>, vector<8x8xf32> -> vector<8x8xf32>
    %cst_8 = arith.constant 0.176776692 : f32
    %15 = vector.broadcast %cst_8 : f32 to vector<8x8xf32>
    %16 = arith.mulf %14, %15 : vector<8x8xf32>
    %17 = tpu.iota {dimensions = array<i32: 0>} : vector<8x8xi32>
    %18 = tpu.iota {dimensions = array<i32: 1>} : vector<8x8xi32>
    %19 = arith.subi %18, %17 : vector<8x8xi32>
    %20 = arith.subi %1, %3 : i32
    %c8_i32 = arith.constant 8 : i32
    %21 = arith.muli %20, %c8_i32 : i32
    %22 = vector.broadcast %21 : i32 to vector<8x8xi32>
    %23 = arith.cmpi sle, %19, %22 : vector<8x8xi32>
    %cst_9 = arith.constant -1.000000e+30 : f32
    %24 = vector.broadcast %cst_9 : f32 to vector<8x8xf32>
    %25 = arith.select %23, %16, %24 : vector<8x8xi1>, vector<8x8xf32>
    %c0_10 = arith.constant 0 : index
    %c0_11 = arith.constant 0 : index
    %26 = vector.load %arg10[%c0_10, %c0_11] : memref<8x1xf32, #tpu.memory_space<vmem>>, vector<8x1xf32>
    %cst_12 = arith.constant dense<0xFF800000> : vector<8xf32>
    %27 = vector.multi_reduction <maximumf>, %25, %cst_12 [1] : vector<8x8xf32> to vector<8xf32>
    %28 = vector.shape_cast %27 : vector<8xf32> to vector<8x1xf32>
    %29 = arith.maximumf %26, %28 : vector<8x1xf32>
    %30 = arith.subf %26, %29 : vector<8x1xf32>
    %31 = math.exp %30 : vector<8x1xf32>
    %32 = vector.broadcast %29 : vector<8x1xf32> to vector<8x8xf32>
    %33 = arith.subf %25, %32 : vector<8x8xf32>
    %34 = math.exp %33 : vector<8x8xf32>
    %c0_13 = arith.constant 0 : index
    %c0_14 = arith.constant 0 : index
    %35 = vector.load %arg11[%c0_13, %c0_14] : memref<8x1xf32, #tpu.memory_space<vmem>>, vector<8x1xf32>
    %36 = arith.mulf %31, %35 : vector<8x1xf32>
    %cst_15 = arith.constant dense<0.000000e+00> : vector<8xf32>
    %37 = vector.multi_reduction <add>, %34, %cst_15 [1] : vector<8x8xf32> to vector<8xf32>
    %38 = vector.shape_cast %37 : vector<8xf32> to vector<8x1xf32>
    %39 = arith.addf %36, %38 : vector<8x1xf32>
    %c0_16 = arith.constant 0 : index
    %c0_17 = arith.constant 0 : index
    %40 = vector.load %arg11[%c0_16, %c0_17] : memref<8x1xf32, #tpu.memory_space<vmem>>, vector<8x1xf32>
    tpu.vector_store %arg11[%c0_16, %c0_17], %39 {strides = array<i32>} : memref<8x1xf32, #tpu.memory_space<vmem>>, vector<8x1xf32>,
    %c0_18 = arith.constant 0 : index
    %c0_19 = arith.constant 0 : index
    %41 = vector.load %arg12[%c0_18, %c0_19] : memref<8x128xf32, #tpu.memory_space<vmem>>, vector<8x128xf32>
    %42 = vector.broadcast %31 : vector<8x1xf32> to vector<8x128xf32>
    %43 = arith.mulf %42, %41 : vector<8x128xf32>
    %cst_20 = arith.constant dense<0.000000e+00> : vector<8x128xf32>
    %44 = tpu.matmul %34, %12, %cst_20 {dimension_numbers = #tpu.dot_dimension_numbers<[1], [0], [0], [1], [0, 0, 1, 1], [], []>} : vector<8x8xf32>, vector<8x128xf32>, vector<8x128xf32> -> vector<8x128xf32>
    %45 = arith.addf %43, %44 : vector<8x128xf32>
    %c0_21 = arith.constant 0 : index
    %c0_22 = arith.constant 0 : index
    %46 = vector.load %arg12[%c0_21, %c0_22] : memref<8x128xf32, #tpu.memory_space<vmem>>, vector<8x128xf32>
    tpu.vector_store %arg12[%c0_21, %c0_22], %45 {strides = array<i32>} : memref<8x128xf32, #tpu.memory_space<vmem>>, vector<8x128xf32>,
    %c0_23 = arith.constant 0 : index
    %c0_24 = arith.constant 0 : index
    %47 = vector.load %arg10[%c0_23, %c0_24] : memref<8x1xf32, #tpu.memory_space<vmem>>, vector<8x1xf32>
    tpu.vector_store %arg10[%c0_23, %c0_24], %29 {strides = array<i32>} : memref<8x1xf32, #tpu.memory_space<vmem>>, vector<8x1xf32>,
    %48 = arith.cmpi eq, %3, %1 : i32
    %49 = arith.extui %48 : i1 to i32
    %c0_i32_25 = arith.constant 0 : i32
    %50 = arith.cmpi ne, %49, %c0_i32_25 : i32
    scf.if %50 {
      %c0_26 = arith.constant 0 : index
      %c0_27 = arith.constant 0 : index
      %51 = vector.load %arg12[%c0_26, %c0_27] : memref<8x128xf32, #tpu.memory_space<vmem>>, vector<8x128xf32>
      %c0_28 = arith.constant 0 : index
      %c0_29 = arith.constant 0 : index
      %52 = vector.load %arg11[%c0_28, %c0_29] : memref<8x1xf32, #tpu.memory_space<vmem>>, vector<8x1xf32>
      %53 = tpu.reciprocal %52 : vector<8x1xf32> -> vector<8x1xf32>
      %54 = vector.broadcast %53 : vector<8x1xf32> to vector<8x128xf32>
      %55 = arith.mulf %51, %54 : vector<8x128xf32>
      %c0_30 = arith.constant 0 : index
      %c0_31 = arith.constant 0 : index
      %c0_32 = arith.constant 0 : index
      %56 = vector.load %arg8[%c0_30, %c0_31, %c0_32] : memref<1x8x128xf32, #tpu.memory_space<vmem>>, vector<1x8x128xf32>
      %57 = vector.shape_cast %56 : vector<1x8x128xf32> to vector<8x128xf32>
      %58 = vector.shape_cast %55 : vector<8x128xf32> to vector<1x8x128xf32>
      tpu.vector_store %arg8[%c0_30, %c0_31, %c0_32], %58 {strides = array<i32>} : memref<1x8x128xf32, #tpu.memory_space<vmem>>, vector<1x8x128xf32>,
    } else {
    }
    return
  }
  func.func @transform_0(%arg0: i32, %arg1: i32, %arg2: memref<1xi32, #tpu.memory_space<smem>>, %arg3: memref<1xi32, #tpu.memory_space<smem>>) -> (i32, i32, i32) {
    %0 = arith.index_cast %arg1 : i32 to index
    %1 = memref.load %arg2[%0] : memref<1xi32, #tpu.memory_space<smem>>
    %c0_i32 = arith.constant 0 : i32
    %c0_i32_0 = arith.constant 0 : i32
    return %arg0, %1, %c0_i32 : i32, i32, i32
  }
  func.func @transform_1(%arg0: i32, %arg1: i32, %arg2: memref<1xi32, #tpu.memory_space<smem>>, %arg3: memref<1xi32, #tpu.memory_space<smem>>) -> (i32, i32, i32) {
    %0 = arith.index_cast %arg1 : i32 to index
    %1 = memref.load %arg3[%0] : memref<1xi32, #tpu.memory_space<smem>>
    %c0_i32 = arith.constant 0 : i32
    %c0_i32_0 = arith.constant 0 : i32
    return %arg0, %1, %c0_i32 : i32, i32, i32
  }
  func.func @transform_2(%arg0: i32, %arg1: i32, %arg2: memref<1xi32, #tpu.memory_space<smem>>, %arg3: memref<1xi32, #tpu.memory_space<smem>>) -> (i32, i32) {
    %c0_i32 = arith.constant 0 : i32
    %c0_i32_0 = arith.constant 0 : i32
    %c0_i32_1 = arith.constant 0 : i32
    return %c0_i32, %c0_i32_0 : i32, i32
  }
  func.func @transform_3(%arg0: i32, %arg1: i32, %arg2: memref<1xi32, #tpu.memory_space<smem>>, %arg3: memref<1xi32, #tpu.memory_space<smem>>) -> (i32, i32) {
    %c0_i32 = arith.constant 0 : i32
    %c0_i32_0 = arith.constant 0 : i32
    %c0_i32_1 = arith.constant 0 : i32
    return %c0_i32, %c0_i32_0 : i32, i32
  }
  func.func @transform_4(%arg0: i32, %arg1: i32, %arg2: memref<1xi32, #tpu.memory_space<smem>>, %arg3: memref<1xi32, #tpu.memory_space<smem>>) -> (i32, i32, i32) {
    %0 = arith.index_cast %arg1 : i32 to index
    %1 = memref.load %arg2[%0] : memref<1xi32, #tpu.memory_space<smem>>
    %c0_i32 = arith.constant 0 : i32
    %c0_i32_0 = arith.constant 0 : i32
    return %arg0, %1, %c0_i32 : i32, i32, i32
  }
}

</mosaic_0001>

<bundles_post_ra>
// kernel: tpu_custom_call.1
= control target key start
LH: loop header
LB: loop body
LE: loop exit
PB: predicated region body
PF: predicated region fallthrough
CT: control target
= control target key end

     0   :  { %s1692_s0 = inlined_call_operand.<no memory space> [shape: s32[1], index: 0, kind: input, shape index: {}]   ;;  %s1693_s1 = inlined_call_operand.<no memory space> [shape: s32[1], index: 1, kind: input, shape index: {}]   ;;  %s1694_s2 = inlined_call_operand.hbm [shape: f32[2,8,32], index: 2, kind: input, shape index: {}]   ;;  %s1695_s3 = inlined_call_operand.hbm [shape: f32[2,8,32], index: 3, kind: input, shape index: {}]   ;;  %s1696_s4 = inlined_call_operand.hbm [shape: f32[32,128], index: 4, kind: input, shape index: {}]   ;;  %s1697_s5 = inlined_call_operand.hbm [shape: f32[32,256], index: 5, kind: input, shape index: {}]   ;;  %s1698_s6 = inlined_call_operand.hbm [shape: f32[2,8,128], index: 6, kind: output, shape index: {}]  }
   0x1   :  { %1713 = sst [smem:[#allocation29_spill]] %s1696_s4 }
   0x2   :  { %1714 = sst [smem:[#allocation30_spill]] %s1697_s5 }
   0x3   :  { %1715 = sst [smem:[#allocation31_spill]] %s1698_s6 }
   0x4   :  { %11 = sst [smem:[#allocation7]] %s1692_s0 }
   0x5   :  { %12 = sst [smem:[#allocation8]] %s1693_s1 }
   0x6   :  { %13 = vsyncpa [#allocation10], 0 }
   0x7   :  { %15 = vsyncpa [#allocation10 + $0x1], 0 }
   0x8   :  { %16 = vsyncpa [#allocation13], 0 }
   0x9   :  { %18 = vsyncpa [#allocation13 + $0x1], 0 }
   0xa   :  { %19 = vsyncpa [#allocation16], 0 }
   0xb   :  { %20 = vsyncpa [#allocation11], 0 }
   0xc   :  { %22 = vsyncpa [#allocation11 + $0x1], 0  ;;  %s1350_s25 = smov 0   ;;  %s1352_s26 = smov 0  }
   0xd   :  { %s1354_s27 = smov 0   ;;  %s1356_s28 = smov 0  }
   0xe   :  { %s1358_s0 = smov 0   ;;  %s1360_s29 = smov 0  }
   0xf   :  { %s1362_s1 = smov 0   ;;  %s1364_s30 = smov 0  }
  0x10   :  { %s1366_s7 = smov 0   ;;  %s1368_s8 = smov 0  }
  0x11   :  { %s1370_s9 = smov 0   ;;  %s1372_s10 = smov 0  }
  0x12 LB: > { %1716 = sst [smem:[#allocation23_spill]] %s1247_s25  ;;  %s1411_s11 = sadd.s32 4294967295, %s1291_s10   ;;  %s1291_s10 = sphi %s1372_s10, %s28_s10   ;;  %s1287_s9 = sphi %s1370_s9, %s1766_s9   ;;  %s1283_s8 = sphi %s1368_s8, %s1765_s8   ;;  %s1279_s7 = sphi %s1366_s7, %s1764_s7   ;;  %s1275_s30 = sphi %s1364_s30, %s1763_s30   ;;  %s1271_s1 = sphi %s1362_s1, %s1762_s1   ;;  %s1267_s29 = sphi %s1360_s29, %s1761_s29   ;;  %s1263_s0 = sphi %s1358_s0, %s1760_s0   ;;  %s1259_s28 = sphi %s1356_s28, %s1759_s28   ;;  %s1255_s27 = sphi %s1354_s27, %s1758_s27   ;;  %s1251_s26 = sphi %s1352_s26, %s1757_s26   ;;  %s1247_s25 = sphi %s1350_s25, %s1756_s25  }
  0x13   : > { %1717 = sst [smem:[#allocation24_spill]] %s1283_s8  ;;  %s832_s12 = sadd.s32 4294967294, %s1291_s10  }
  0x14   : > { %p1699_p0 = scmp.eq.s32.totalorder %s1411_s11, 0  ;;  %p163_p1 = scmp.ne.s32.totalorder %s1255_s27, %s1251_s26 }
  0x15   : > { %p164_p2 = scmp.eq.s32.totalorder %s1411_s11, 1  ;;  %p169_p3 = scmp.ne.s32.totalorder %s1251_s26, %s1247_s25 }
  0x16   : > { %p170_p4 = scmp.eq.s32.totalorder %s832_s12, 1  ;;  %p833_p5 = scmp.ge.s32.totalorder %s1291_s10, 1 }
  0x17   : > { %p1421_p6 = por %p164_p2, %p163_p1  ;;  %p177_p7 = scmp.lt.s32.totalorder %s1291_s10, 3 }
  0x18   : > { %p1426_p8 = por %p170_p4, %p169_p3  ;;  %s1293_s16 = smov [#allocation14]  }
  0x19   : > { %s1718_s13 = scalar_select %p1421_p6, 1, 0 }
  0x1a   : > { %s1720_s14 = scalar_select %p1426_p8, 1, 0 }
  0x1b   : > { %1719 = sst [smem:[#allocation25_spill]] %s1718_s13  ;;  %p1430_p9 = pnand %p833_p5, %p177_p7 }
  0x1c   : > { %1721 = sst [smem:[#allocation26_spill]] %s1720_s14  ;;  %s189_s17 = sshll.u32 %s1293_s16, 4  ;;  %s190_s17 = int_to_ptr.vmem [resolvable:$true] %s189_s17 }
  0x1d   : > { %s1722_s15 = scalar_select %p1430_p9, 1, 0 }
  0x1e   : > { %p901_p10 = pneg %p1430_p9  ;;  %s1294_s19 = smov [#allocation15]  }
  0x1f   : > { %s202_s20 = sshll.u32 %s1294_s19, 4  ;;  %s1054_s21 = scalar_lea.vmem %s190_s17, 512  ;;  %s203_s20 = int_to_ptr.vmem [resolvable:$true] %s202_s20 }
  0x20   : > { %p1439_p12 = pnand %p901_p10, %p1699_p0  ;;  %p1055_p1 = scmp.ne.s32.totalorder %s190_s17, %s1054_s21 }
  0x21   : > { %p1062_p4 = scmp.lt.s32.totalorder %s190_s17, %s190_s17  ;;  %p1063_p5 = scmp.lt.s32.totalorder %s1054_s21, %s1054_s21 }
  0x22   : > { %p1045_p13 = pneg %p1439_p12 }
  0x23   : > { %p1064_p7 = por %p1063_p5, %p1062_p4 }
  0x24   : > { %p1057_p2 = pnand %p1055_p1, %p1045_p13 }
  0x26   : > { %p1058_p3 = pneg %p1057_p2 }
  0x28   : > { %p1065_p10 = pnand %p1064_p7, %p1058_p3 }
  0x2a   : > { %1068 = shalt.err (!%p1065_p10)
}
  0x2b   : > { %s1295_s22 = smov 128   ;;  %s1296_s23 = smov 8  }
  0x2c   : > { %s1724_s4 = sld [smem:[#allocation29_spill]]  ;;  %s1080_s16 = scalar_lea.vmem %s203_s20, 1024 }
  0x2d   : > { %p1081_p11 = scmp.ne.s32.totalorder %s203_s20, %s1080_s16  ;;  %p1088_p0 = scmp.lt.s32.totalorder %s203_s20, %s203_s20 }
  0x2e   : > { %p1089_p8 = scmp.lt.s32.totalorder %s1080_s16, %s1080_s16 }
  0x2f   : > { %p1083_p1 = pnand %p1081_p11, %p1045_p13 }
  0x30   : > { %p1090_p4 = por %p1089_p8, %p1088_p0 }
  0x31   : > { %p1084_p2 = pneg %p1083_p1 }
  0x32   : > { %904 = dma.hbm_to_vmem [thread:$0]  (!%p1439_p12), %s1724_s4, 512, %s190_s17, [#allocation13], %s1295_s22, %s1295_s22, %s1296_s23  }
  0x33   : > { %p1091_p3 = pnand %p1090_p4, %p1084_p2 }
  0x35   : > { %1094 = shalt.err (!%p1091_p3)
}
  0x36   : > { %s1297_s19 = smov 256   ;;  %s1298_s17 = smov 16  }
  0x37   : > { %s1725_s5 = sld [smem:[#allocation30_spill]]  ;;  %s40_s23 = sadd.s32 1, %s1287_s9 }
  0x38   : > { %p42_p0 = scmp.ge.s32.totalorder %s40_s23, 2  ;;  %s44_s24 = sld [smem:[#allocation7]] }
  0x39   : > { %s51_s12 = sadd.s32 1, %s1279_s7  ;;  %p58_p8 = scmp.ne.s32.totalorder %s1279_s7, %s1275_s30 }
  0x3a   : > { %s1768_s23 = smov (%p42_p0, %s40_s23), 0  ;;  %p1707_p11 = scmp.eq.s32.totalorder %s1291_s10, 0 }
  0x3b   : > { %1726 = sst [smem:[#allocation27_spill]] %s1768_s23  ;;  %p64_p13 = scmp.ne.s32.totalorder %s1275_s30, %s1271_s1 }
  0x3c   : > { %s46_s16 = ssub.s32 %s1287_s9, %s1768_s23  ;;  %s1472_s18 = sld [smem:[#allocation8]] }
  0x3d   : > { %907 = dma.hbm_to_vmem [thread:$0]  (!%p1439_p12), %s1725_s5, 1024, %s203_s20, [#allocation16], %s1297_s19, %s1297_s19, %s1298_s17  }
  0x3e   : > { %p1476_p12 = por %p1707_p11, %p58_p8  ;;  %p1728_p5 = scmp.eq.s32.totalorder %s1411_s11, 0 }
  0x3f   : > { %s153_s17 = sadd.s32 1, %s1255_s27  ;;  %p1706_p10 = scmp.lt.s32.totalorder %s1291_s10, 2 }
  0x40   : > { %p1482_p7 = por %p1728_p5, %p64_p13  ;;  %p1488_p1 = scmp.eq.s32.totalorder %s46_s16, 0 }
  0x41   : > { %s216_s1 = sand.u32 1, %s1279_s7   ;;  %s225_s5 = sadd.s32 %s1287_s9, %s44_s24 }
  0x42   : > { %s1729_s19 = scalar_select %p1482_p7, 1, 0 }
  0x43   : > { %s1730_s21 = scalar_select %p1488_p1, 1, 0 }
  0x44   : > { %s837_s22 = sshll.u32 %s216_s1, 3  ;;  %s838_s23 = sshll.u32 %s225_s5, 7 }
  0x45   : > { %s1496_s4 = scalar_select %p1488_p1, %s1279_s7, %s51_s12  }
  0x46   : > { %s1502_s14 = scalar_select %p1488_p1, %s1255_s27, %s153_s17  }
  0x47   : > { %1731 = sst [smem:[#allocation28_spill]] %s1496_s4  ;;  %s1507_s13 = scalar_lea.hbm %s1694_s2, %s838_s23 }
  0x48   : > { %s220_s16 = scalar_lea.vmem [#allocation9], %s837_s22  ;;  %p1513_p2 = pnand %p1706_p10, %p1476_p12 }
  0x49   : > { %s229_s8 = sshll.u32 %s220_s16, 4  ;;  %s217_s5 = scalar_lea.sflag [#allocation10], %s216_s1  ;;  %s230_s8 = int_to_ptr.vmem [resolvable:$true] %s229_s8 }
  0x4a   : > { %s1095_s24 = scalar_lea.hbm %s1507_s13, 128  ;;  %p1097_p3 = pneg %p1513_p2 }
  0x4b   : > { %p1096_p4 = scmp.ne.s32.totalorder %s1507_s13, %s1095_s24  ;;  %s1100_s23 = scalar_lea.hbm %s1694_s2, 256 }
  0x4c   : > { %p1101_p13 = scmp.lt.s32.totalorder %s1507_s13, %s1694_s2  ;;  %p1102_p12 = scmp.lt.s32.totalorder %s1100_s23, %s1095_s24 }
  0x4d   : > { %p1098_p0 = pnand %p1097_p3, %p1096_p4 }
  0x4e   : > { %p1103_p5 = por %p1102_p12, %p1101_p13 }
  0x4f   : > { %p1099_p8 = pneg %p1098_p0 }
  0x51   : > { %p1104_p10 = pnand %p1103_p5, %p1099_p8 }
  0x53   : > { %1107 = shalt.err (!%p1104_p10)
}
  0x54   : > { %s1108_s20 = scalar_lea.vmem %s230_s8, 128  ;;  %s1299_s1 = smov [#allocation9]  }
  0x55   : > { %p1109_p11 = scmp.ne.s32.totalorder %s230_s8, %s1108_s20  ;;  %s1113_s16 = sshll.u32 %s1299_s1, 4  ;;  %s1114_s16 = int_to_ptr.vmem [resolvable:$false] %s1113_s16 }
  0x56   : > { %s1115_s4 = scalar_lea.vmem %s1114_s16, 256  ;;  %p1116_p4 = scmp.lt.s32.totalorder %s230_s8, %s1114_s16 }
  0x57   : > { %p1111_p6 = pnand %p1109_p11, %p1097_p3  ;;  %p1117_p0 = scmp.lt.s32.totalorder %s1115_s4, %s1108_s20 }
  0x59   : > { %p1112_p7 = pneg %p1111_p6  ;;  %p1118_p9 = por %p1117_p0, %p1116_p4 }
  0x5b   : > { %p1119_p1 = pnand %p1118_p9, %p1112_p7 }
  0x5d   : > { %1122 = shalt.err (!%p1119_p1)
}
  0x5e   : > { %911 = dma.hbm_to_vmem [thread:$0]  (!%p1513_p2), %s1507_s13, 128, %s230_s8, %s217_s5  }
  0x5f   : > { %s81_s4 = sadd.s32 1, %s1267_s29  ;;  %p1733_p6 = scmp.ne.s32.totalorder %s1730_s21, 0 }
  0x60   : > { %p88_p9 = scmp.ne.s32.totalorder %s1267_s29, %s1263_s0  ;;  %p94_p11 = scmp.ne.s32.totalorder %s1263_s0, %s1259_s28 }
  0x61   : > { %s1535_s24 = scalar_select %p1733_p6, %s1267_s29, %s81_s4  }
  0x62   : > { %s238_s12 = sand.u32 1, %s1267_s29   ;;  %p1734_p7 = scmp.eq.s32.totalorder %s1411_s11, 0 }
  0x63   : > { %s236_s25 = sand.u32 1, %s1291_s10   ;;  %p1736_p1 = scmp.eq.s32.totalorder %s1291_s10, 0 }
  0x64   : > { %p1544_p10 = por %p94_p11, %p1734_p7  ;;  %s839_s23 = sshll.u32 %s238_s12, 3 }
  0x65   : > { %p90_p3 = por %p88_p9, %p1736_p1  ;;  %s245_s17 = sadd.s32 %s1287_s9, %s1472_s18 }
  0x66   : > { %s1735_s6 = scalar_select %p1544_p10, 1, 0 }
  0x67   : > { %s840_s22 = sshll.u32 %s245_s17, 7  ;;  %s240_s8 = scalar_lea.vmem [#allocation12], %s839_s23 }
  0x68   : > { %s249_s13 = sshll.u32 %s240_s8, 4  ;;  %s1556_s20 = scalar_lea.hbm %s1695_s3, %s840_s22  ;;  %s250_s13 = int_to_ptr.vmem [resolvable:$true] %s249_s13 }
  0x69   : > { %p1737_p2 = scmp.lt.s32.totalorder %s1291_s10, 2  ;;  %s237_s1 = scalar_lea.sflag [#allocation13], %s236_s25 }
  0x6a   : > { %s1123_s18 = scalar_lea.hbm %s1556_s20, 128  ;;  %s1128_s12 = scalar_lea.hbm %s1695_s3, 256 }
  0x6b   : > { %p1560_p8 = pnand %p1737_p2, %p90_p3  ;;  %p1124_p13 = scmp.ne.s32.totalorder %s1556_s20, %s1123_s18 }
  0x6c   : > { %p1129_p0 = scmp.lt.s32.totalorder %s1556_s20, %s1695_s3  ;;  %p1130_p6 = scmp.lt.s32.totalorder %s1128_s12, %s1123_s18 }
  0x6d   : > { %p1125_p12 = pneg %p1560_p8 }
  0x6e   : > { %p1131_p9 = por %p1130_p6, %p1129_p0 }
  0x6f   : > { %p1126_p5 = pnand %p1125_p12, %p1124_p13 }
  0x71   : > { %p1127_p4 = pneg %p1126_p5 }
  0x73   : > { %p1132_p11 = pnand %p1131_p9, %p1127_p4 }
  0x75   : > { %1135 = shalt.err (!%p1132_p11)
}
  0x76   : > { %s1136_s22 = scalar_lea.vmem %s250_s13, 128  ;;  %s1300_s25 = smov [#allocation12]  }
  0x77   : > { %p1137_p7 = scmp.ne.s32.totalorder %s250_s13, %s1136_s22  ;;  %s1141_s8 = sshll.u32 %s1300_s25, 4  ;;  %s1142_s8 = int_to_ptr.vmem [resolvable:$false] %s1141_s8 }
  0x78   : > { %s1143_s5 = scalar_lea.vmem %s1142_s8, 256  ;;  %p1144_p2 = scmp.lt.s32.totalorder %s250_s13, %s1142_s8 }
  0x79   : > { %p1139_p1 = pnand %p1137_p7, %p1125_p12  ;;  %p1145_p13 = scmp.lt.s32.totalorder %s1143_s5, %s1136_s22 }
  0x7b   : > { %p1140_p3 = pneg %p1139_p1  ;;  %p1146_p5 = por %p1145_p13, %p1144_p2 }
  0x7d   : > { %p1147_p10 = pnand %p1146_p5, %p1140_p3 }
  0x7f   : > { %1150 = shalt.err (!%p1147_p10)
}
  0x80   : > { %914 = dma.hbm_to_vmem [thread:$0]  (!%p1560_p8), %s1556_s20, 128, %s250_s13, %s237_s1  }
  0x81   : > { %p1739_p4 = scmp.ne.s32.totalorder %s1722_s15, 0 }
  0x82   : > { %s260_s21 = sand.u32 (!%p1739_p4), 1, %s1275_s30   ;;  %p1740_p12 = scmp.ne.s32.totalorder (!%p1739_p4), %s1729_s19, 0 }
  0x83   : > { %258 = sbr.rel (%p1739_p4) target bundleno = 1417 (0x589), region = 36  ;;  %s1581_s18 = sshll.u32 (!%p1739_p4), %s260_s21, 3 }
  0x84   : > { %s261_s16 = scalar_lea.sflag (!%p1739_p4), [#allocation10], %s260_s21  ;;  %s264_s4 = scalar_lea.vmem (!%p1739_p4), [#allocation9], %s1581_s18 }
  0x88   : > { %1226 = dma.done.wait (%p1740_p12), %s261_s16, 128  }
  0x89   : > { %1228 = vsyncadd (%p1740_p12), %s261_s16, 4294967168  ;;  %s269_s13 = sand.u32 1, %s1411_s11   ;;  %s271_s20 = sand.u32 1, %s1263_s0  }
  0x8a   : > { %s1590_s15 = sshll.u32 %s271_s20, 3  ;;  %s270_s28 = scalar_lea.sflag [#allocation13], %s269_s13 }
  0x8b   : > { %s273_s1 = scalar_lea.vmem [#allocation12], %s1590_s15  ;;  %p1741_p10 = scmp.ne.s32.totalorder %s1735_s6, 0 }
  0x8d   : > { %1230 = dma.done.wait (%p1741_p10), %s270_s28, 128  }
  0x8e   : > { %1232 = vsyncadd (%p1741_p10), %s270_s28, 4294967168  ;;  %p1742_p8 = scmp.eq.s32.totalorder %s1411_s11, 0 }
  0x90   : > { %1234 = dma.done.wait (%p1742_p8), [#allocation13], 512   ;;  %p1743_p0 = pmov %p1742_p8 }
  0x92   : > { %1236 = vsyncadd (%p1743_p0), [#allocation13], 4294966784  ;;  %p1744_p6 = pmov %p1743_p0 }
  0x93   : > { %p1745_p9 = pmov %p1743_p0 }
  0x94   : > { %1238 = dma.done.wait (%p1744_p6), [#allocation16], 1024  }
  0x95   : > { %1240 = vsyncadd (%p1745_p9), [#allocation16], 4294966272  ;;  %s308_s19 = sand.u32 1, %s1251_s26   ;;  %s1606_s12 = sld [smem:[#allocation7]] }
  0x96   : > { %s1610_s6 = sshll.u32 %s308_s19, 3  ;;  %s1612_s23 = sld [smem:[#allocation8]] }
  0x97   : > { %s310_s17 = scalar_lea.vmem [#allocation17], %s1610_s6 }
  0x9c   : > { %p847_p11 = scmp.ne.s32.totalorder %s1612_s23, 0 }
  0x9e   : > { %319 = sbr.rel (%p847_p11) target bundleno = 367 (0x16f), region = 56 }
  0xa3   : > { %vm400_vm0 = vcmask 7168   ;;  %v324_v0 = vld [vmem:[#allocation14 + $0x18] sm:$0xff]  ;;  %v1301_v1 = vmov 0.0   ;;  %v1302_v2 = vmov -1e+30   ;;  %v323_v3 = vld [vmem:[#allocation14 + $0x10] sm:$0xff] }
  0xa4   : > { %866 = vmatprep.subr.mxu0 %v1301_v1  ;;  %401 = vst.msk [vmem:[#allocation3] sm:$0xff] %vm400_vm0, %v1302_v2  ;;  %402 = vst.msk [vmem:[#allocation4] sm:$0xff] %vm400_vm0, %v1301_v1  ;;  %vm1303_vm1 = vmmov 0   ;;  %v322_v4 = vld [vmem:[#allocation14 + $0x8] sm:$0xff]  ;;  %v321_v5 = vld [vmem:[#allocation14] sm:$0xff]  ;;  %vm325_vm2 = vcmask 261120  }
  0xa5   : > { %403 = vst [vmem:[#allocation5] sm:$0xff] %v1301_v1  ;;  %867 = vmatpush3.msra.mxu0 %v324_v0  ;;  %874 = vmatprep.mubr.msk.f32.mxu0 %vm1303_vm1, %v1301_v1  ;;  %v320_v6 = vld [vmem:[%s264_s4] sm:$0xff] }
  0xa6   : > { %868 = vmatprep.subr.mxu0 %v1301_v1 }
  0xa7   : > { %869 = vmatpush3.msra.mxu0 %v323_v3 }
  0xa8   : > { %870 = vmatprep.subr.mxu0 %v1301_v1 }
  0xa9   : > { %871 = vmatpush3.msra.mxu0 %v322_v4 }
  0xaa   : > { %872 = vmatprep.subr.mxu0 %v1301_v1 }
  0xab   : > { %873 = vmatpush3.msra.mxu0 %v321_v5 }
  0xac   : > { %875 = vmatmul.mubr.msk.f32.vlgmr.msra.gmra.mxu0 %vm325_vm2, %v320_v6 }
 0x16c   : > { %v395_v7 = vpop.f32.mrf.mxu0 }
 0x16d   : > { %399 = vst [vmem:[#allocation2] sm:$0xff] %v395_v7 }
 0x16e   : > { %v876_v8 = vpop.f32.mrf.mxu0 }
 0x16f PF: > { %v412_v9 = vld [vmem:[#allocation15 + $0x38] sm:$0xff]  ;;  %v411_v10 = vld [vmem:[#allocation15 + $0x30] sm:$0xff]  ;;  %v410_v11 = vld [vmem:[#allocation15 + $0x28] sm:$0xff]  ;;  %v1304_v13 = vmov 0.0   ;;  %vm413_vm3 = vcmask 261120   ;;  %vm1305_vm4 = vmmov 0   ;;  %v560_v22 = vlaneseq  ;;  %s565_s11 = ssub.s32 %s1606_s12, %s1612_s23  ;;  %p852_p7 = scmp.ne.s32.totalorder %s1612_s23, %s1606_s12 }
 0x170   : > { %441 = vmatprep.subr.mxu0 %v412_v9  ;;  %v409_v12 = vld [vmem:[#allocation15 + $0x20] sm:$0xff]  ;;  %481 = vmatprep.mubr.f32.mxu0 %v1304_v13  ;;  %v408_v14 = vld [vmem:[#allocation15 + $0x18] sm:$0xff]  ;;  %v407_v15 = vld [vmem:[#allocation15 + $0x10] sm:$0xff]  ;;  %s850_s22 = sshll.u32 %s565_s11, 3  ;;  %vm571_vm6 = vcmask 64512   ;;  %v1306_v32 = vmov 0  }
 0x171   : > { %442 = vmatpush1.msra.mxu0 %v411_v10  ;;  %877 = vmatprep.subr.mxu1 %v1304_v13  ;;  %v406_v16 = vld [vmem:[#allocation15 + $0x8] sm:$0xff]  ;;  %v405_v17 = vld [vmem:[#allocation15] sm:$0xff]  ;;  %v404_v18 = vld [vmem:[%s273_s1] sm:$0xff]  ;;  %v561_v23 = vshrl.u32 %v560_v22, 7  ;;  %v563_v24 = vand.u32 127, %v560_v22  ;;  %v567_v26 = vstv %s850_s22  ;;  %vm593_vm7 = vcmask 7168  }
 0x172   : > { %443 = vmatprep.subr.mxu0 %v410_v11  ;;  %879 = vmatprep.mubr.msk.f32.mxu1 %vm1305_vm4, %v1304_v13  ;;  %v570_v33 = vld [vmem:[#allocation3] sm:$0xff]  ;;  %v587_v44 = vld [vmem:[#allocation4] sm:$0xff]  ;;  %v595_v48 = vld [vmem:[#allocation5] sm:$0xff] }
 0x173   : > { %444 = vmatpush1.msra.mxu0 %v409_v12  ;;  %v564_v25 = vsub.s32 %v563_v24, %v561_v23  ;;  %1034 = vset.pattern.permute.xlu0 %v1306_v32 }
 0x174   : > { %445 = vmatprep.subr.mxu0 %v408_v14  ;;  %v488_v20 = vld [vmem:[#allocation2] sm:$0xff]  ;;  %1035 = vset.pattern.permute.xlu1 %v1306_v32 }
 0x175   : > { %446 = vmatpush1.msra.mxu0 %v407_v15  ;;  %vm568_vm5 = vcmp.le.s32.totalorder %v564_v25, %v567_v26 }
 0x176   : > { %447 = vmatprep.subr.mxu0 %v406_v16 }
 0x177   : > { %448 = vmatpush1.msra.mxu0 %v405_v17 }
 0x178   : > { %849 = vmatmul.mubr.msk.f32.vlgmr.msra.gmra.mxu0 %vm413_vm3, %v404_v18 }
 0x238   : > { %v483_v19 = vpop.f32.mrf.mxu0 }
 0x239   : > { %878 = vmatpush3.xpose.msra.mxu1 %v483_v19 }
 0x23a   : > { %882 = vmatprep.subr.mxu1 %v1304_v13  ;;  %v485_v21 = vpop.f32.mrf.mxu0 }
 0x23c   : > { %880 = vmatmul.mubr.f32.vlgmr.msra.gmra.mxu1 %v488_v20 }
 0x23d   : > { %883 = vmatpush3.msra.mxu1 %v485_v21  ;;  %884 = vmatprep.mubr.msk.f32.mxu1 %vm1305_vm4, %v1304_v13 }
 0x2fc   : > { %v555_v27 = vpop.f32.mrf.mxu1 }
 0x2fd   : > { %v559_v28 = vmul.f32 0.17677669, %v555_v27 }
 0x2fe   : > { %v881_v29 = vpop.f32.mrf.mxu1 }
 0x2ff   : > { %v569_v30 = vsel %vm568_vm5, %v559_v28, -1e+30 }
 0x300   : > { %v572_v31 = vsel %vm571_vm6, %v569_v30, -inf }
 0x301   : > { %573 = vmax.xlane.f32.xlu0 %v572_v31 }
 0x38a   : > { %v574_v34 = vpop.xlane.xlu0 %573 }
 0x38b   : > { %v575_v35 = vmax.f32 %v570_v33, %v574_v34 }
 0x38d   : > { %v576_v36 = vsub.f32 %v570_v33, %v575_v35  ;;  %677 = vst.msk [vmem:[#allocation3] sm:$0xff] %vm593_vm7, %v575_v35  ;;  %581 = vperm.xlu0 %1034, %v575_v35  }
 0x38f   : > { %v577_v41 = vmul.f32 1.442695, %v576_v36 }
 0x408   : > { %v582_v37 = vpop.permute.xlu0 %581 }
 0x409   : > { %v584_v38 = vsub.f32 %v569_v30, %v582_v37 }
 0x40b   : > { %v585_v39 = vmul.f32 1.442695, %v584_v38 }
 0x40d   : > { %1036 = vpow2.f32 %v585_v39 }
 0x40e   : > { %1038 = vpow2.f32 %v577_v41 }
 0x41a   : > { %v1037_v40 = vpop.eup %1036 }
 0x41b   : > { %885 = vmatmul.mubr.msk.f32.vlgmr.msra.gmra.mxu1 %vm571_vm6, %v1037_v40  ;;  %v589_v42 = vsel %vm571_vm6, %v1037_v40, 0.0  ;;  %v1039_v43 = vpop.eup %1038 }
 0x41c   : > { %590 = vadd.xlane.f32.xlu1 %v589_v42  ;;  %v588_v45 = vmul.f32 %v1039_v43, %v587_v44 }
 0x42d   : > { %598 = vperm.xlu1 %1035, %v1039_v43  }
 0x4a5   : > { %v591_v46 = vpop.xlane.xlu1 %590 }
 0x4a6   : > { %v592_v47 = vadd.f32 %v591_v46, %v588_v45 }
 0x4a8   : > { %594 = vst.msk [vmem:[#allocation4] sm:$0xff] %vm593_vm7, %v592_v47 }
 0x4a9   : > { %v599_v49 = vpop.permute.xlu1 %598 }
 0x4aa   : > { %v601_v50 = vmul.f32 %v599_v49, %v595_v48 }
 0x4da   : > { %681 = sbr.rel (%p852_p7) target bundleno = 1389 (0x56d), region = 60 }
 0x4db   : > { %v671_v51 = vpop.f32.mrf.mxu1 }
 0x4dc   : > { %v675_v52 = vadd.f32 %v671_v51, %v601_v50 }
 0x4dd   : > { %v886_v53 = vpop.f32.mrf.mxu1 }
 0x4de   : > { %676 = vst [vmem:[#allocation5] sm:$0xff] %v675_v52 }
 0x4df   : > { %v683_v54 = vld [vmem:[#allocation4] sm:$0xff]  ;;  %v1307_v55 = vmov 0  }
 0x4e0   : > { %1040 = vset.pattern.permute.xlu0 %v1307_v55  ;;  %1041 = vrcp.f32 %v683_v54 }
 0x4e5   : > { %v682_v57 = vld [vmem:[#allocation5] sm:$0xff] }
 0x4ed   : > { %v1042_v56 = vpop.eup %1041 }
 0x4ee   : > { %687 = vperm.xlu0 %1040, %v1042_v56  }
 0x569   : > { %v688_v58 = vpop.permute.xlu0 %687 }
 0x56a   : > { %v690_v59 = vmul.f32 %v688_v58, %v682_v57 }
 0x56c   : > { %691 = vst [vmem:[%s310_s17] sm:$0xff] %v690_v59 }
 0x56d PF: > { %s700_s25 = sld [smem:[#allocation7]]  ;;  %s708_s21 = sshll.u32 %s310_s17, 4  ;;  %s709_s21 = int_to_ptr.vmem [resolvable:$true] %s708_s21 }
 0x56e   : > { %s1746_s8 = sld [smem:[#allocation24_spill]]  ;;  %s693_s28 = scalar_lea.sflag [#allocation11], %s308_s19 }
 0x56f   : > { %s1747_s5 = sld [smem:[#allocation25_spill]]  ;;  %s1151_s1 = scalar_lea.vmem %s709_s21, 128 }
 0x570   : > { %s1748_s20 = sld [smem:[#allocation31_spill]]  ;;  %p1152_p1 = scmp.ne.s32.totalorder %s709_s21, %s1151_s1 }
 0x571   : > { %s1308_s12 = smov [#allocation17]  }
 0x572   : > { %s1155_s6 = sshll.u32 %s1308_s12, 4  ;;  %s1156_s6 = int_to_ptr.vmem [resolvable:$false] %s1155_s6 }
 0x573   : > { %s1157_s23 = scalar_lea.vmem %s1156_s6, 256  ;;  %p1158_p5 = scmp.lt.s32.totalorder %s709_s21, %s1156_s6 }
 0x574   : > { %s704_s18 = sadd.s32 %s1746_s8, %s700_s25  ;;  %p1159_p4 = scmp.lt.s32.totalorder %s1157_s23, %s1151_s1 }
 0x575   : > { %s854_s16 = sshll.u32 %s704_s18, 7  ;;  %p1749_p3 = scmp.ne.s32.totalorder %s1747_s5, 0 }
 0x576   : > { %s706_s15 = scalar_lea.hbm %s1748_s20, %s854_s16  ;;  %p1160_p12 = por %p1159_p4, %p1158_p5 }
 0x577   : > { %p1153_p2 = pnand %p1152_p1, %p1749_p3 }
 0x579   : > { %p1154_p13 = pneg %p1153_p2 }
 0x57b   : > { %p1161_p10 = pnand %p1160_p12, %p1154_p13 }
 0x57d   : > { %1164 = shalt.err (!%p1161_p10)
}
 0x57e   : > { %s1165_s17 = scalar_lea.hbm %s706_s15, 128  ;;  %s1169_s22 = scalar_lea.hbm %s1748_s20, 256 }
 0x57f   : > { %p1166_p8 = scmp.ne.s32.totalorder %s706_s15, %s1165_s17  ;;  %p1170_p9 = scmp.lt.s32.totalorder %s706_s15, %s1748_s20 }
 0x580   : > { %p1171_p11 = scmp.lt.s32.totalorder %s1169_s22, %s1165_s17 }
 0x581   : > { %p1167_p0 = pnand %p1166_p8, %p1749_p3 }
 0x582   : > { %p1172_p7 = por %p1171_p11, %p1170_p9 }
 0x583   : > { %p1168_p6 = pneg %p1167_p0 }
 0x585   : > { %p1173_p1 = pnand %p1172_p7, %p1168_p6 }
 0x587   : > { %1176 = shalt.err (!%p1173_p1)
}
 0x588   : > { %899 = dma.vmem_to_hbm [thread:$0]  (%p1749_p3), %s709_s21, 128, %s706_s15, %s693_s28  }
 0x589 PF: > { %s1750_s18 = sld [smem:[#allocation23_spill]]  ;;  %p1753_p13 = scmp.ge.s32.totalorder %s1291_s10, 2 }
 0x58a   : > { %s1751_s16 = sld [smem:[#allocation26_spill]] }
 0x58f   : > { %s720_s4 = sand.u32 1, %s1750_s18  }
 0x590   : > { %p1752_p2 = scmp.ne.s32.totalorder %s1751_s16, 0  ;;  %s721_s13 = scalar_lea.sflag [#allocation11], %s720_s4 }
 0x592   : > { %p916_p5 = pnand %p1753_p13, %p1752_p2 }
 0x594   : > { %p917_p4 = pneg %p916_p5 }
 0x596   : > { %1242 = dma.done.wait (%p917_p4), %s721_s13, 128  }
 0x597   : > { %1244 = vsyncadd (%p917_p4), %s721_s13, 4294967168  ;;  %s28_s10 = sadd.s32 1, %s1291_s10   ;;  %s1754_s5 = sld [smem:[#allocation28_spill]] }
 0x598   : > { %p25_p12 = scmp.ge.s32.totalorder %s28_s10, 4   ;;  %s1755_s21 = sld [smem:[#allocation27_spill]] }
 0x599   : > { %s1756_s25 = smov %s1251_s26  ;;  %s1757_s26 = smov %s1255_s27 }
 0x59a   : > { %s1758_s27 = smov %s1502_s14  ;;  %s1759_s28 = smov %s1263_s0 }
 0x59b   : > { %s1760_s0 = smov %s1267_s29  ;;  %s1761_s29 = smov %s1535_s24 }
 0x59c   : > { %s1762_s1 = smov %s1275_s30  ;;  %s1763_s30 = smov %s1279_s7 }
 0x59d   : > { %s1764_s7 = smov %s1754_s5  ;;  %s1765_s8 = smov %s1287_s9 }
 0x59e   : > { %s1766_s9 = smov %s1755_s21  ;;  %27 = sbr.rel (!%p25_p12) target bundleno = 18 (0x12), region = 110 }
 0x5a3   :  { %726 = vsyncpa [#allocation10], 1 }
 0x5a4   :  { %728 = vsyncpa [#allocation10 + $0x1], 1 }
 0x5a5   :  { %729 = vsyncpa [#allocation13], 1 }
 0x5a6   :  { %731 = vsyncpa [#allocation13 + $0x1], 1 }
 0x5a7   :  { %732 = vsyncpa [#allocation16], 1 }
 0x5a8   :  { %733 = vsyncpa [#allocation11], 1 }
 0x5a9   :  { %735 = vsyncpa [#allocation11 + $0x1], 1 }

</bundles_post_ra>
